<compile_context>
chip_gen: v5e
topology: v5e:2x2
jax: 0.10.0
libtpu: 0.0.40
codegen_flags: <defaults>
</compile_context>

<pallas_src>
import jax
import jax.numpy as jnp
from jax import lax
from jax.experimental import pallas as pl
from jax.experimental.pallas import tpu as pltpu


def _round_up(x, m):
    return (x + m - 1) // m * m


# ----------------------------------------------------------------------------
# Pallas kernel: one grid step = f_tile features x b_tile bags x one vocab tile.
# ----------------------------------------------------------------------------
def _pooled_embedding_bags_kernel(idx_ref, tbl_ref, out_ref):
    """idx_ref: (f_tile, b_tile, L) int32 bag indices, padded with -1
    tbl_ref: (f_tile, v_tile, D) table tile (bf16 or f32)
    out_ref: (b_tile, f_tile*D) f32 resident accumulator (over the vocab axis)
    """
    vi = pl.program_id(2)                       # vocab tile = innermost reduction

    @pl.when(vi == 0)
    def _init():                                # accumulate into the resident output block
        out_ref[...] = jnp.zeros_like(out_ref)

    f_tile, b_tile, L = idx_ref.shape
    v_tile, D = tbl_ref.shape[1], tbl_ref.shape[2]
    v_start = vi * v_tile                       # first global vocab id of this tile

    # Hoisted out of the feature loop (JAX does not CSE broadcast_in_dim).
    viota = lax.broadcasted_iota(jnp.int32, (b_tile, v_tile), 1) + v_start

    for f in range(f_tile):                     # small static unroll over grouped features
        ids = idx_ref[f]                        # (b_tile, L) int32, -1 padding
        # counts[b, v] = #{l : ids[b, l] == v_start + v}.  Padded slots (-1)
        # and ids from other vocab tiles never match, so they contribute 0
        # with no mask tensor / select.
        counts = jnp.zeros((b_tile, v_tile), jnp.float32)
        for l in range(L):                      # L is a small static pad length
            counts = counts + (ids[:, l][:, None] == viota).astype(jnp.float32)
        # TODO(synk): for long multi-hot bags (L >> 8) switch this unroll to a
        # lax.fori_loop to bound live ranges.

        # Sum-pool as an MXU matmul: (b_tile, v_tile) @ (v_tile, D) -> (b_tile, D).
        part = jnp.dot(counts.astype(tbl_ref.dtype), tbl_ref[f],
                       preferred_element_type=jnp.float32)
        # Accumulate straight into the correct lane slice of the resident
        # output block: static slice, no in-kernel concatenate / parts list.
        out_ref[:, pl.ds(f * D, D)] += part


# ----------------------------------------------------------------------------
# Tiling heuristics (generation-aware VMEM budgets).
# ----------------------------------------------------------------------------
def _vmem_capacity_bytes():
    try:
        cap = int(getattr(pltpu.get_tpu_info(), "vmem_capacity_bytes", 0) or 0)
        if cap > 0:
            return cap
    except Exception:
        pass
    return 64 * 1024 * 1024          # v7x-safe fallback


def _pick_f_tile(F, D):
    """Smallest feature group whose packed output slab (f_tile*D lanes) is a
    multiple of 128 lanes; falls back to all F (block == full dim, legal)."""
    for t in range(1, F + 1):
        if F % t == 0 and (t * D) % 128 == 0:
            return t
    return F


def _pick_b_tile(B):
    """Batch tile: multiple of 8, capped at 256 (fat MXU M + parallel work)."""
    return min(_round_up(max(B, 1), 8), 256)


def _pick_v_tile(V, f_tile, D, itemsize, cap_bytes):
    """Vocab tile: full V if the double-buffered table block fits the cap,
    otherwise the largest multiple of 128 that does (no divisor requirement;
    the wrapper zero-pads V up to a multiple of v_tile)."""
    if 2 * f_tile * V * D * itemsize <= cap_bytes:
        return V
    per_row = 2 * f_tile * D * itemsize          # double-buffered bytes per vocab row
    vt = (cap_bytes // per_row) // 128 * 128
    return int(max(128, min(vt, _round_up(V, 128))))


# ----------------------------------------------------------------------------
# pallas_call wrapper.
# ----------------------------------------------------------------------------
def pooled_embeddings_pallas(idx_fbl, tables_fvd, *, use_bf16=True):
    """idx_fbl: (F, B, L) int32 (-1 padded), tables_fvd: (F, V, D) float
    returns (B, F, D) float32 pooled embeddings."""
    F, B, L = idx_fbl.shape
    Ft, V, D = tables_fvd.shape
    assert Ft == F

    if use_bf16:
        # bf16 tables in HBM: halves the dominant table stream + VMEM blocks.
        # TODO(synk): in a real deployment cast/pad the tables once at init.
        tables_fvd = tables_fvd.astype(jnp.bfloat16)

    vmem_cap = _vmem_capacity_bytes()
    vmem_limit = int(min(0.75 * vmem_cap, 100 * 1024 * 1024))
    f_tile = _pick_f_tile(F, D)
    b_tile = _pick_b_tile(B)
    v_tile = _pick_v_tile(V, f_tile, D, tables_fvd.dtype.itemsize,
                          cap_bytes=vmem_limit // 2)

    # Pad vocab/batch so tiles divide exactly.  Zero vocab rows never receive a
    # nonzero count; -1 padded bags pool to zero rows that are sliced off below.
    V_pad = _round_up(V, v_tile)
    B_pad = _round_up(B, b_tile)
    if V_pad != V:
        tables_fvd = jnp.pad(tables_fvd, ((0, 0), (0, V_pad - V), (0, 0)))
    if B_pad != B:
        idx_fbl = jnp.pad(idx_fbl, ((0, 0), (0, B_pad - B), (0, 0)),
                          constant_values=-1)

    grid = (B_pad // b_tile, F // f_tile, V_pad // v_tile)  # reduction axis last

    out = pl.pallas_call(
        _pooled_embedding_bags_kernel,
        out_shape=jax.ShapeDtypeStruct((B_pad, F * D), jnp.float32),
        grid_spec=pltpu.PrefetchScalarGridSpec(
            num_scalar_prefetch=0,
            grid=grid,
            in_specs=[
                pl.BlockSpec((f_tile, b_tile, L), lambda bi, fi, vi: (fi, bi, 0)),
                pl.BlockSpec((f_tile, v_tile, D), lambda bi, fi, vi: (fi, vi, 0)),
            ],
            # Output block index independent of vi -> resident f32 accumulator.
            out_specs=pl.BlockSpec((b_tile, f_tile * D),
                                   lambda bi, fi, vi: (bi, fi)),
        ),
        compiler_params=pltpu.CompilerParams(
            dimension_semantics=("parallel", "parallel", "arbitrary"),
            vmem_limit_bytes=vmem_limit,
        ),
    )(idx_fbl, tables_fvd)

    # (B_pad, F*D) -> slice padding -> (B, F, D): contiguous last-dim split,
    # matches torch.cat(dim=1).reshape(B, F, D).
    return out[:B].reshape(B, F, D)


# ----------------------------------------------------------------------------
# Glue: jagged (values, offsets) -> dense (B, L) indices, padded with -1.
# NOTE: caller must choose max_len >= max bag length; longer bags would be
# truncated (torchrec EmbeddingBag never truncates).
# ----------------------------------------------------------------------------
def _jagged_to_dense(values, offsets, max_len):
    values = values.astype(jnp.int32)
    n = values.shape[0]
    B = offsets.shape[0] - 1
    if n == 0:
        return jnp.full((B, max_len), -1, jnp.int32)
    lengths = offsets[1:] - offsets[:-1]                       # (B,)
    pos = offsets[:-1, None] + jnp.arange(max_len)[None, :]    # (B, L)
    valid = jnp.arange(max_len)[None, :] < lengths[:, None]    # (B, L)
    pos = jnp.clip(pos, 0, n - 1)
    return jnp.where(valid, values[pos], -1).astype(jnp.int32)


def sparse_arch_forward(features, feature_names, tables_fvd, max_len,
                        *, use_bf16=True):
    """JAX equivalent of SparseArchTraceAbleWrapper.forward -> (B, F, D) f32."""
    idx_fbl = jnp.stack(
        [_jagged_to_dense(features[n]["values"], features[n]["offsets"],
                          max_len) for n in feature_names], axis=0)
    return pooled_embeddings_pallas(idx_fbl, tables_fvd, use_bf16=use_bf16)


# ----------------------------------------------------------------------------
# Pure-JAX reference for the correctness check.
# ----------------------------------------------------------------------------
def _reference(idx_fbl, tables_fvd, *, use_bf16):
    tbl = tables_fvd
    if use_bf16:   # match the kernel's bf16 table rounding
        tbl = tbl.astype(jnp.bfloat16).astype(jnp.float32)
    valid = (idx_fbl >= 0)
    safe = jnp.where(valid, idx_fbl, 0)
    gathered = jax.vmap(lambda t, i: t[i])(tbl, safe)          # (F, B, L, D)
    pooled = (gathered * valid[..., None].astype(jnp.float32)).sum(axis=2)
    return jnp.transpose(pooled, (1, 0, 2))                    # (B, F, D)


if __name__ == "__main__":
    # Small, DLRM-flavored synthetic config.
    F = 4          # number of sparse features / embedding bags
    V = 64         # vocab (rows) per table
    D = 32         # embedding dim  (F*D = 128 -> lane-dense output slab)
    B = 8          # batch size (bags per feature)
    L_MAX = 8      # max bag length (pad target)

    key = jax.random.PRNGKey(0)
    k_tbl, k_len, k_val = jax.random.split(key, 3)

    # Deterministic "EmbeddingBag" weights: (F, V, D).
    tables = jax.random.normal(k_tbl, (F, V, D), dtype=jnp.float32) * 0.05

    feature_names = [f"cat_{i}" for i in range(F)]
    features = {}
    len_keys = jax.random.split(k_len, F)
    val_keys = jax.random.split(k_val, F)
    for i, name in enumerate(feature_names):
        lengths = jax.random.randint(len_keys[i], (B,), 1, L_MAX + 1)
        offsets = jnp.concatenate(
            [jnp.zeros((1,), jnp.int32), jnp.cumsum(lengths).astype(jnp.int32)])
        nnz = int(offsets[-1])   # host sync: test-harness construction only
        values = jax.random.randint(val_keys[i], (nnz,), 0, V, dtype=jnp.int32)
        features[name] = {"values": values, "offsets": offsets}

    out = sparse_arch_forward(features, feature_names, tables, L_MAX)
    out = jax.block_until_ready(out)
    assert out.shape == (B, F, D), out.shape
    assert out.dtype == jnp.float32

    # Correctness vs. pure-JAX reference (same bf16 table rounding).
    idx_fbl = jnp.stack(
        [_jagged_to_dense(features[n]["values"], features[n]["offsets"],
                          L_MAX) for n in feature_names], axis=0)
    ref = _reference(idx_fbl, tables, use_bf16=True)
    max_err = float(jnp.max(jnp.abs(out - ref)))
    assert jnp.allclose(out, ref, atol=1e-4, rtol=1e-4), max_err

    print("KERNEL_OK")
</pallas_src>

<mosaic_0001>
module attributes {stable_mosaic.version = 11 : i64} {
  func.func @_pooled_embedding_bags_kernel(%arg0: i32, %arg1: i32, %arg2: i32, %arg3: memref<4x8x8xi32, #tpu.memory_space<vmem>>, %arg4: memref<4x64x32xbf16, #tpu.memory_space<vmem>>, %arg5: memref<8x128xf32, #tpu.memory_space<vmem>>) attributes {dimension_semantics = [#tpu.dimension_semantics<parallel>, #tpu.dimension_semantics<parallel>, #tpu.dimension_semantics<arbitrary>], iteration_bounds = array<i64: 1, 1, 1>, scalar_prefetch = 0 : i64, scratch_operands = 0 : i64, tpu.core_type = #tpu.core_type<tc>, window_params = [{transform_indices = @transform_0, window_bounds = array<i64: 4, 8, 8>}, {transform_indices = @transform_1, window_bounds = array<i64: 4, 64, 32>}, {transform_indices = @transform_2, window_bounds = array<i64: 8, 128>}]} {
    %c0_i32 = arith.constant 0 : i32
    %0 = arith.cmpi eq, %arg2, %c0_i32 : i32
    %1 = arith.extui %0 : i1 to i32
    %c0_i32_0 = arith.constant 0 : i32
    %2 = arith.cmpi ne, %1, %c0_i32_0 : i32
    scf.if %2 {
      %cst_41 = arith.constant 0.000000e+00 : f32
      %303 = vector.broadcast %cst_41 : f32 to vector<8x128xf32>
      %c0_42 = arith.constant 0 : index
      %c0_43 = arith.constant 0 : index
      %304 = vector.load %arg5[%c0_42, %c0_43] : memref<8x128xf32, #tpu.memory_space<vmem>>, vector<8x128xf32>
      tpu.vector_store %arg5[%c0_42, %c0_43], %303 {strides = array<i32>} : memref<8x128xf32, #tpu.memory_space<vmem>>, vector<8x128xf32>,
    } else {
    }
    %c64_i32 = arith.constant 64 : i32
    %3 = arith.muli %arg2, %c64_i32 : i32
    %4 = tpu.iota {dimensions = array<i32: 1>} : vector<8x64xi32>
    %5 = vector.broadcast %3 : i32 to vector<8x64xi32>
    %6 = arith.addi %4, %5 : vector<8x64xi32>
    %c0 = arith.constant 0 : index
    %c0_1 = arith.constant 0 : index
    %c0_2 = arith.constant 0 : index
    %7 = vector.load %arg3[%c0, %c0_1, %c0_2] : memref<4x8x8xi32, #tpu.memory_space<vmem>>, vector<1x8x8xi32>
    %8 = vector.shape_cast %7 : vector<1x8x8xi32> to vector<8x8xi32>
    %cst = arith.constant 0.000000e+00 : f32
    %9 = vector.broadcast %cst : f32 to vector<8x64xf32>
    %10 = vector.extract_strided_slice %8 {offsets = [0, 0], sizes = [8, 1], strides = [1, 1]} : vector<8x8xi32> to vector<8x1xi32>
    %11 = vector.shape_cast %10 : vector<8x1xi32> to vector<8xi32>
    %12 = vector.shape_cast %11 : vector<8xi32> to vector<8x1xi32>
    %13 = vector.broadcast %12 : vector<8x1xi32> to vector<8x64xi32>
    %14 = arith.cmpi eq, %13, %6 : vector<8x64xi32>
    %15 = arith.extui %14 : vector<8x64xi1> to vector<8x64xi32>
    %16 = arith.sitofp %15 : vector<8x64xi32> to vector<8x64xf32>
    %17 = arith.addf %9, %16 : vector<8x64xf32>
    %18 = vector.extract_strided_slice %8 {offsets = [0, 1], sizes = [8, 1], strides = [1, 1]} : vector<8x8xi32> to vector<8x1xi32>
    %19 = vector.shape_cast %18 : vector<8x1xi32> to vector<8xi32>
    %20 = vector.shape_cast %19 : vector<8xi32> to vector<8x1xi32>
    %21 = vector.broadcast %20 : vector<8x1xi32> to vector<8x64xi32>
    %22 = arith.cmpi eq, %21, %6 : vector<8x64xi32>
    %23 = arith.extui %22 : vector<8x64xi1> to vector<8x64xi32>
    %24 = arith.sitofp %23 : vector<8x64xi32> to vector<8x64xf32>
    %25 = arith.addf %17, %24 : vector<8x64xf32>
    %26 = vector.extract_strided_slice %8 {offsets = [0, 2], sizes = [8, 1], strides = [1, 1]} : vector<8x8xi32> to vector<8x1xi32>
    %27 = vector.shape_cast %26 : vector<8x1xi32> to vector<8xi32>
    %28 = vector.shape_cast %27 : vector<8xi32> to vector<8x1xi32>
    %29 = vector.broadcast %28 : vector<8x1xi32> to vector<8x64xi32>
    %30 = arith.cmpi eq, %29, %6 : vector<8x64xi32>
    %31 = arith.extui %30 : vector<8x64xi1> to vector<8x64xi32>
    %32 = arith.sitofp %31 : vector<8x64xi32> to vector<8x64xf32>
    %33 = arith.addf %25, %32 : vector<8x64xf32>
    %34 = vector.extract_strided_slice %8 {offsets = [0, 3], sizes = [8, 1], strides = [1, 1]} : vector<8x8xi32> to vector<8x1xi32>
    %35 = vector.shape_cast %34 : vector<8x1xi32> to vector<8xi32>
    %36 = vector.shape_cast %35 : vector<8xi32> to vector<8x1xi32>
    %37 = vector.broadcast %36 : vector<8x1xi32> to vector<8x64xi32>
    %38 = arith.cmpi eq, %37, %6 : vector<8x64xi32>
    %39 = arith.extui %38 : vector<8x64xi1> to vector<8x64xi32>
    %40 = arith.sitofp %39 : vector<8x64xi32> to vector<8x64xf32>
    %41 = arith.addf %33, %40 : vector<8x64xf32>
    %42 = vector.extract_strided_slice %8 {offsets = [0, 4], sizes = [8, 1], strides = [1, 1]} : vector<8x8xi32> to vector<8x1xi32>
    %43 = vector.shape_cast %42 : vector<8x1xi32> to vector<8xi32>
    %44 = vector.shape_cast %43 : vector<8xi32> to vector<8x1xi32>
    %45 = vector.broadcast %44 : vector<8x1xi32> to vector<8x64xi32>
    %46 = arith.cmpi eq, %45, %6 : vector<8x64xi32>
    %47 = arith.extui %46 : vector<8x64xi1> to vector<8x64xi32>
    %48 = arith.sitofp %47 : vector<8x64xi32> to vector<8x64xf32>
    %49 = arith.addf %41, %48 : vector<8x64xf32>
    %50 = vector.extract_strided_slice %8 {offsets = [0, 5], sizes = [8, 1], strides = [1, 1]} : vector<8x8xi32> to vector<8x1xi32>
    %51 = vector.shape_cast %50 : vector<8x1xi32> to vector<8xi32>
    %52 = vector.shape_cast %51 : vector<8xi32> to vector<8x1xi32>
    %53 = vector.broadcast %52 : vector<8x1xi32> to vector<8x64xi32>
    %54 = arith.cmpi eq, %53, %6 : vector<8x64xi32>
    %55 = arith.extui %54 : vector<8x64xi1> to vector<8x64xi32>
    %56 = arith.sitofp %55 : vector<8x64xi32> to vector<8x64xf32>
    %57 = arith.addf %49, %56 : vector<8x64xf32>
    %58 = vector.extract_strided_slice %8 {offsets = [0, 6], sizes = [8, 1], strides = [1, 1]} : vector<8x8xi32> to vector<8x1xi32>
    %59 = vector.shape_cast %58 : vector<8x1xi32> to vector<8xi32>
    %60 = vector.shape_cast %59 : vector<8xi32> to vector<8x1xi32>
    %61 = vector.broadcast %60 : vector<8x1xi32> to vector<8x64xi32>
    %62 = arith.cmpi eq, %61, %6 : vector<8x64xi32>
    %63 = arith.extui %62 : vector<8x64xi1> to vector<8x64xi32>
    %64 = arith.sitofp %63 : vector<8x64xi32> to vector<8x64xf32>
    %65 = arith.addf %57, %64 : vector<8x64xf32>
    %66 = vector.extract_strided_slice %8 {offsets = [0, 7], sizes = [8, 1], strides = [1, 1]} : vector<8x8xi32> to vector<8x1xi32>
    %67 = vector.shape_cast %66 : vector<8x1xi32> to vector<8xi32>
    %68 = vector.shape_cast %67 : vector<8xi32> to vector<8x1xi32>
    %69 = vector.broadcast %68 : vector<8x1xi32> to vector<8x64xi32>
    %70 = arith.cmpi eq, %69, %6 : vector<8x64xi32>
    %71 = arith.extui %70 : vector<8x64xi1> to vector<8x64xi32>
    %72 = arith.sitofp %71 : vector<8x64xi32> to vector<8x64xf32>
    %73 = arith.addf %65, %72 : vector<8x64xf32>
    %74 = arith.truncf %73 : vector<8x64xf32> to vector<8x64xbf16>
    %c0_3 = arith.constant 0 : index
    %c0_4 = arith.constant 0 : index
    %c0_5 = arith.constant 0 : index
    %75 = vector.load %arg4[%c0_3, %c0_4, %c0_5] : memref<4x64x32xbf16, #tpu.memory_space<vmem>>, vector<1x64x32xbf16>
    %76 = vector.shape_cast %75 : vector<1x64x32xbf16> to vector<64x32xbf16>
    %cst_6 = arith.constant dense<0.000000e+00> : vector<8x32xf32>
    %77 = tpu.matmul %74, %76, %cst_6 {dimension_numbers = #tpu.dot_dimension_numbers<[1], [0], [0], [1], [0, 0, 1, 1], [], []>} : vector<8x64xbf16>, vector<64x32xbf16>, vector<8x32xf32> -> vector<8x32xf32>
    %c0_7 = arith.constant 0 : index
    %c0_8 = arith.constant 0 : index
    %78 = vector.load %arg5[%c0_7, %c0_8] : memref<8x128xf32, #tpu.memory_space<vmem>>, vector<8x32xf32>
    %79 = arith.addf %78, %77 : vector<8x32xf32>
    %c0_9 = arith.constant 0 : index
    %c0_10 = arith.constant 0 : index
    %80 = vector.load %arg5[%c0_9, %c0_10] : memref<8x128xf32, #tpu.memory_space<vmem>>, vector<8x32xf32>
    tpu.vector_store %arg5[%c0_9, %c0_10], %79 {strides = array<i32>} : memref<8x128xf32, #tpu.memory_space<vmem>>, vector<8x32xf32>,
    %c1 = arith.constant 1 : index
    %c0_11 = arith.constant 0 : index
    %c0_12 = arith.constant 0 : index
    %81 = vector.load %arg3[%c1, %c0_11, %c0_12] : memref<4x8x8xi32, #tpu.memory_space<vmem>>, vector<1x8x8xi32>
    %82 = vector.shape_cast %81 : vector<1x8x8xi32> to vector<8x8xi32>
    %cst_13 = arith.constant 0.000000e+00 : f32
    %83 = vector.broadcast %cst_13 : f32 to vector<8x64xf32>
    %84 = vector.extract_strided_slice %82 {offsets = [0, 0], sizes = [8, 1], strides = [1, 1]} : vector<8x8xi32> to vector<8x1xi32>
    %85 = vector.shape_cast %84 : vector<8x1xi32> to vector<8xi32>
    %86 = vector.shape_cast %85 : vector<8xi32> to vector<8x1xi32>
    %87 = vector.broadcast %86 : vector<8x1xi32> to vector<8x64xi32>
    %88 = arith.cmpi eq, %87, %6 : vector<8x64xi32>
    %89 = arith.extui %88 : vector<8x64xi1> to vector<8x64xi32>
    %90 = arith.sitofp %89 : vector<8x64xi32> to vector<8x64xf32>
    %91 = arith.addf %83, %90 : vector<8x64xf32>
    %92 = vector.extract_strided_slice %82 {offsets = [0, 1], sizes = [8, 1], strides = [1, 1]} : vector<8x8xi32> to vector<8x1xi32>
    %93 = vector.shape_cast %92 : vector<8x1xi32> to vector<8xi32>
    %94 = vector.shape_cast %93 : vector<8xi32> to vector<8x1xi32>
    %95 = vector.broadcast %94 : vector<8x1xi32> to vector<8x64xi32>
    %96 = arith.cmpi eq, %95, %6 : vector<8x64xi32>
    %97 = arith.extui %96 : vector<8x64xi1> to vector<8x64xi32>
    %98 = arith.sitofp %97 : vector<8x64xi32> to vector<8x64xf32>
    %99 = arith.addf %91, %98 : vector<8x64xf32>
    %100 = vector.extract_strided_slice %82 {offsets = [0, 2], sizes = [8, 1], strides = [1, 1]} : vector<8x8xi32> to vector<8x1xi32>
    %101 = vector.shape_cast %100 : vector<8x1xi32> to vector<8xi32>
    %102 = vector.shape_cast %101 : vector<8xi32> to vector<8x1xi32>
    %103 = vector.broadcast %102 : vector<8x1xi32> to vector<8x64xi32>
    %104 = arith.cmpi eq, %103, %6 : vector<8x64xi32>
    %105 = arith.extui %104 : vector<8x64xi1> to vector<8x64xi32>
    %106 = arith.sitofp %105 : vector<8x64xi32> to vector<8x64xf32>
    %107 = arith.addf %99, %106 : vector<8x64xf32>
    %108 = vector.extract_strided_slice %82 {offsets = [0, 3], sizes = [8, 1], strides = [1, 1]} : vector<8x8xi32> to vector<8x1xi32>
    %109 = vector.shape_cast %108 : vector<8x1xi32> to vector<8xi32>
    %110 = vector.shape_cast %109 : vector<8xi32> to vector<8x1xi32>
    %111 = vector.broadcast %110 : vector<8x1xi32> to vector<8x64xi32>
    %112 = arith.cmpi eq, %111, %6 : vector<8x64xi32>
    %113 = arith.extui %112 : vector<8x64xi1> to vector<8x64xi32>
    %114 = arith.sitofp %113 : vector<8x64xi32> to vector<8x64xf32>
    %115 = arith.addf %107, %114 : vector<8x64xf32>
    %116 = vector.extract_strided_slice %82 {offsets = [0, 4], sizes = [8, 1], strides = [1, 1]} : vector<8x8xi32> to vector<8x1xi32>
    %117 = vector.shape_cast %116 : vector<8x1xi32> to vector<8xi32>
    %118 = vector.shape_cast %117 : vector<8xi32> to vector<8x1xi32>
    %119 = vector.broadcast %118 : vector<8x1xi32> to vector<8x64xi32>
    %120 = arith.cmpi eq, %119, %6 : vector<8x64xi32>
    %121 = arith.extui %120 : vector<8x64xi1> to vector<8x64xi32>
    %122 = arith.sitofp %121 : vector<8x64xi32> to vector<8x64xf32>
    %123 = arith.addf %115, %122 : vector<8x64xf32>
    %124 = vector.extract_strided_slice %82 {offsets = [0, 5], sizes = [8, 1], strides = [1, 1]} : vector<8x8xi32> to vector<8x1xi32>
    %125 = vector.shape_cast %124 : vector<8x1xi32> to vector<8xi32>
    %126 = vector.shape_cast %125 : vector<8xi32> to vector<8x1xi32>
    %127 = vector.broadcast %126 : vector<8x1xi32> to vector<8x64xi32>
    %128 = arith.cmpi eq, %127, %6 : vector<8x64xi32>
    %129 = arith.extui %128 : vector<8x64xi1> to vector<8x64xi32>
    %130 = arith.sitofp %129 : vector<8x64xi32> to vector<8x64xf32>
    %131 = arith.addf %123, %130 : vector<8x64xf32>
    %132 = vector.extract_strided_slice %82 {offsets = [0, 6], sizes = [8, 1], strides = [1, 1]} : vector<8x8xi32> to vector<8x1xi32>
    %133 = vector.shape_cast %132 : vector<8x1xi32> to vector<8xi32>
    %134 = vector.shape_cast %133 : vector<8xi32> to vector<8x1xi32>
    %135 = vector.broadcast %134 : vector<8x1xi32> to vector<8x64xi32>
    %136 = arith.cmpi eq, %135, %6 : vector<8x64xi32>
    %137 = arith.extui %136 : vector<8x64xi1> to vector<8x64xi32>
    %138 = arith.sitofp %137 : vector<8x64xi32> to vector<8x64xf32>
    %139 = arith.addf %131, %138 : vector<8x64xf32>
    %140 = vector.extract_strided_slice %82 {offsets = [0, 7], sizes = [8, 1], strides = [1, 1]} : vector<8x8xi32> to vector<8x1xi32>
    %141 = vector.shape_cast %140 : vector<8x1xi32> to vector<8xi32>
    %142 = vector.shape_cast %141 : vector<8xi32> to vector<8x1xi32>
    %143 = vector.broadcast %142 : vector<8x1xi32> to vector<8x64xi32>
    %144 = arith.cmpi eq, %143, %6 : vector<8x64xi32>
    %145 = arith.extui %144 : vector<8x64xi1> to vector<8x64xi32>
    %146 = arith.sitofp %145 : vector<8x64xi32> to vector<8x64xf32>
    %147 = arith.addf %139, %146 : vector<8x64xf32>
    %148 = arith.truncf %147 : vector<8x64xf32> to vector<8x64xbf16>
    %c1_14 = arith.constant 1 : index
    %c0_15 = arith.constant 0 : index
    %c0_16 = arith.constant 0 : index
    %149 = vector.load %arg4[%c1_14, %c0_15, %c0_16] : memref<4x64x32xbf16, #tpu.memory_space<vmem>>, vector<1x64x32xbf16>
    %150 = vector.shape_cast %149 : vector<1x64x32xbf16> to vector<64x32xbf16>
    %cst_17 = arith.constant dense<0.000000e+00> : vector<8x32xf32>
    %151 = tpu.matmul %148, %150, %cst_17 {dimension_numbers = #tpu.dot_dimension_numbers<[1], [0], [0], [1], [0, 0, 1, 1], [], []>} : vector<8x64xbf16>, vector<64x32xbf16>, vector<8x32xf32> -> vector<8x32xf32>
    %c0_18 = arith.constant 0 : index
    %c32 = arith.constant 32 : index
    %152 = vector.load %arg5[%c0_18, %c32] : memref<8x128xf32, #tpu.memory_space<vmem>>, vector<8x32xf32>
    %153 = arith.addf %152, %151 : vector<8x32xf32>
    %c0_19 = arith.constant 0 : index
    %c32_20 = arith.constant 32 : index
    %154 = vector.load %arg5[%c0_19, %c32_20] : memref<8x128xf32, #tpu.memory_space<vmem>>, vector<8x32xf32>
    tpu.vector_store %arg5[%c0_19, %c32_20], %153 {strides = array<i32>} : memref<8x128xf32, #tpu.memory_space<vmem>>, vector<8x32xf32>,
    %c2 = arith.constant 2 : index
    %c0_21 = arith.constant 0 : index
    %c0_22 = arith.constant 0 : index
    %155 = vector.load %arg3[%c2, %c0_21, %c0_22] : memref<4x8x8xi32, #tpu.memory_space<vmem>>, vector<1x8x8xi32>
    %156 = vector.shape_cast %155 : vector<1x8x8xi32> to vector<8x8xi32>
    %cst_23 = arith.constant 0.000000e+00 : f32
    %157 = vector.broadcast %cst_23 : f32 to vector<8x64xf32>
    %158 = vector.extract_strided_slice %156 {offsets = [0, 0], sizes = [8, 1], strides = [1, 1]} : vector<8x8xi32> to vector<8x1xi32>
    %159 = vector.shape_cast %158 : vector<8x1xi32> to vector<8xi32>
    %160 = vector.shape_cast %159 : vector<8xi32> to vector<8x1xi32>
    %161 = vector.broadcast %160 : vector<8x1xi32> to vector<8x64xi32>
    %162 = arith.cmpi eq, %161, %6 : vector<8x64xi32>
    %163 = arith.extui %162 : vector<8x64xi1> to vector<8x64xi32>
    %164 = arith.sitofp %163 : vector<8x64xi32> to vector<8x64xf32>
    %165 = arith.addf %157, %164 : vector<8x64xf32>
    %166 = vector.extract_strided_slice %156 {offsets = [0, 1], sizes = [8, 1], strides = [1, 1]} : vector<8x8xi32> to vector<8x1xi32>
    %167 = vector.shape_cast %166 : vector<8x1xi32> to vector<8xi32>
    %168 = vector.shape_cast %167 : vector<8xi32> to vector<8x1xi32>
    %169 = vector.broadcast %168 : vector<8x1xi32> to vector<8x64xi32>
    %170 = arith.cmpi eq, %169, %6 : vector<8x64xi32>
    %171 = arith.extui %170 : vector<8x64xi1> to vector<8x64xi32>
    %172 = arith.sitofp %171 : vector<8x64xi32> to vector<8x64xf32>
    %173 = arith.addf %165, %172 : vector<8x64xf32>
    %174 = vector.extract_strided_slice %156 {offsets = [0, 2], sizes = [8, 1], strides = [1, 1]} : vector<8x8xi32> to vector<8x1xi32>
    %175 = vector.shape_cast %174 : vector<8x1xi32> to vector<8xi32>
    %176 = vector.shape_cast %175 : vector<8xi32> to vector<8x1xi32>
    %177 = vector.broadcast %176 : vector<8x1xi32> to vector<8x64xi32>
    %178 = arith.cmpi eq, %177, %6 : vector<8x64xi32>
    %179 = arith.extui %178 : vector<8x64xi1> to vector<8x64xi32>
    %180 = arith.sitofp %179 : vector<8x64xi32> to vector<8x64xf32>
    %181 = arith.addf %173, %180 : vector<8x64xf32>
    %182 = vector.extract_strided_slice %156 {offsets = [0, 3], sizes = [8, 1], strides = [1, 1]} : vector<8x8xi32> to vector<8x1xi32>
    %183 = vector.shape_cast %182 : vector<8x1xi32> to vector<8xi32>
    %184 = vector.shape_cast %183 : vector<8xi32> to vector<8x1xi32>
    %185 = vector.broadcast %184 : vector<8x1xi32> to vector<8x64xi32>
    %186 = arith.cmpi eq, %185, %6 : vector<8x64xi32>
    %187 = arith.extui %186 : vector<8x64xi1> to vector<8x64xi32>
    %188 = arith.sitofp %187 : vector<8x64xi32> to vector<8x64xf32>
    %189 = arith.addf %181, %188 : vector<8x64xf32>
    %190 = vector.extract_strided_slice %156 {offsets = [0, 4], sizes = [8, 1], strides = [1, 1]} : vector<8x8xi32> to vector<8x1xi32>
    %191 = vector.shape_cast %190 : vector<8x1xi32> to vector<8xi32>
    %192 = vector.shape_cast %191 : vector<8xi32> to vector<8x1xi32>
    %193 = vector.broadcast %192 : vector<8x1xi32> to vector<8x64xi32>
    %194 = arith.cmpi eq, %193, %6 : vector<8x64xi32>
    %195 = arith.extui %194 : vector<8x64xi1> to vector<8x64xi32>
    %196 = arith.sitofp %195 : vector<8x64xi32> to vector<8x64xf32>
    %197 = arith.addf %189, %196 : vector<8x64xf32>
    %198 = vector.extract_strided_slice %156 {offsets = [0, 5], sizes = [8, 1], strides = [1, 1]} : vector<8x8xi32> to vector<8x1xi32>
    %199 = vector.shape_cast %198 : vector<8x1xi32> to vector<8xi32>
    %200 = vector.shape_cast %199 : vector<8xi32> to vector<8x1xi32>
    %201 = vector.broadcast %200 : vector<8x1xi32> to vector<8x64xi32>
    %202 = arith.cmpi eq, %201, %6 : vector<8x64xi32>
    %203 = arith.extui %202 : vector<8x64xi1> to vector<8x64xi32>
    %204 = arith.sitofp %203 : vector<8x64xi32> to vector<8x64xf32>
    %205 = arith.addf %197, %204 : vector<8x64xf32>
    %206 = vector.extract_strided_slice %156 {offsets = [0, 6], sizes = [8, 1], strides = [1, 1]} : vector<8x8xi32> to vector<8x1xi32>
    %207 = vector.shape_cast %206 : vector<8x1xi32> to vector<8xi32>
    %208 = vector.shape_cast %207 : vector<8xi32> to vector<8x1xi32>
    %209 = vector.broadcast %208 : vector<8x1xi32> to vector<8x64xi32>
    %210 = arith.cmpi eq, %209, %6 : vector<8x64xi32>
    %211 = arith.extui %210 : vector<8x64xi1> to vector<8x64xi32>
    %212 = arith.sitofp %211 : vector<8x64xi32> to vector<8x64xf32>
    %213 = arith.addf %205, %212 : vector<8x64xf32>
    %214 = vector.extract_strided_slice %156 {offsets = [0, 7], sizes = [8, 1], strides = [1, 1]} : vector<8x8xi32> to vector<8x1xi32>
    %215 = vector.shape_cast %214 : vector<8x1xi32> to vector<8xi32>
    %216 = vector.shape_cast %215 : vector<8xi32> to vector<8x1xi32>
    %217 = vector.broadcast %216 : vector<8x1xi32> to vector<8x64xi32>
    %218 = arith.cmpi eq, %217, %6 : vector<8x64xi32>
    %219 = arith.extui %218 : vector<8x64xi1> to vector<8x64xi32>
    %220 = arith.sitofp %219 : vector<8x64xi32> to vector<8x64xf32>
    %221 = arith.addf %213, %220 : vector<8x64xf32>
    %222 = arith.truncf %221 : vector<8x64xf32> to vector<8x64xbf16>
    %c2_24 = arith.constant 2 : index
    %c0_25 = arith.constant 0 : index
    %c0_26 = arith.constant 0 : index
    %223 = vector.load %arg4[%c2_24, %c0_25, %c0_26] : memref<4x64x32xbf16, #tpu.memory_space<vmem>>, vector<1x64x32xbf16>
    %224 = vector.shape_cast %223 : vector<1x64x32xbf16> to vector<64x32xbf16>
    %cst_27 = arith.constant dense<0.000000e+00> : vector<8x32xf32>
    %225 = tpu.matmul %222, %224, %cst_27 {dimension_numbers = #tpu.dot_dimension_numbers<[1], [0], [0], [1], [0, 0, 1, 1], [], []>} : vector<8x64xbf16>, vector<64x32xbf16>, vector<8x32xf32> -> vector<8x32xf32>
    %c0_28 = arith.constant 0 : index
    %c64 = arith.constant 64 : index
    %226 = vector.load %arg5[%c0_28, %c64] : memref<8x128xf32, #tpu.memory_space<vmem>>, vector<8x32xf32>
    %227 = arith.addf %226, %225 : vector<8x32xf32>
    %c0_29 = arith.constant 0 : index
    %c64_30 = arith.constant 64 : index
    %228 = vector.load %arg5[%c0_29, %c64_30] : memref<8x128xf32, #tpu.memory_space<vmem>>, vector<8x32xf32>
    tpu.vector_store %arg5[%c0_29, %c64_30], %227 {strides = array<i32>} : memref<8x128xf32, #tpu.memory_space<vmem>>, vector<8x32xf32>,
    %c3 = arith.constant 3 : index
    %c0_31 = arith.constant 0 : index
    %c0_32 = arith.constant 0 : index
    %229 = vector.load %arg3[%c3, %c0_31, %c0_32] : memref<4x8x8xi32, #tpu.memory_space<vmem>>, vector<1x8x8xi32>
    %230 = vector.shape_cast %229 : vector<1x8x8xi32> to vector<8x8xi32>
    %cst_33 = arith.constant 0.000000e+00 : f32
    %231 = vector.broadcast %cst_33 : f32 to vector<8x64xf32>
    %232 = vector.extract_strided_slice %230 {offsets = [0, 0], sizes = [8, 1], strides = [1, 1]} : vector<8x8xi32> to vector<8x1xi32>
    %233 = vector.shape_cast %232 : vector<8x1xi32> to vector<8xi32>
    %234 = vector.shape_cast %233 : vector<8xi32> to vector<8x1xi32>
    %235 = vector.broadcast %234 : vector<8x1xi32> to vector<8x64xi32>
    %236 = arith.cmpi eq, %235, %6 : vector<8x64xi32>
    %237 = arith.extui %236 : vector<8x64xi1> to vector<8x64xi32>
    %238 = arith.sitofp %237 : vector<8x64xi32> to vector<8x64xf32>
    %239 = arith.addf %231, %238 : vector<8x64xf32>
    %240 = vector.extract_strided_slice %230 {offsets = [0, 1], sizes = [8, 1], strides = [1, 1]} : vector<8x8xi32> to vector<8x1xi32>
    %241 = vector.shape_cast %240 : vector<8x1xi32> to vector<8xi32>
    %242 = vector.shape_cast %241 : vector<8xi32> to vector<8x1xi32>
    %243 = vector.broadcast %242 : vector<8x1xi32> to vector<8x64xi32>
    %244 = arith.cmpi eq, %243, %6 : vector<8x64xi32>
    %245 = arith.extui %244 : vector<8x64xi1> to vector<8x64xi32>
    %246 = arith.sitofp %245 : vector<8x64xi32> to vector<8x64xf32>
    %247 = arith.addf %239, %246 : vector<8x64xf32>
    %248 = vector.extract_strided_slice %230 {offsets = [0, 2], sizes = [8, 1], strides = [1, 1]} : vector<8x8xi32> to vector<8x1xi32>
    %249 = vector.shape_cast %248 : vector<8x1xi32> to vector<8xi32>
    %250 = vector.shape_cast %249 : vector<8xi32> to vector<8x1xi32>
    %251 = vector.broadcast %250 : vector<8x1xi32> to vector<8x64xi32>
    %252 = arith.cmpi eq, %251, %6 : vector<8x64xi32>
    %253 = arith.extui %252 : vector<8x64xi1> to vector<8x64xi32>
    %254 = arith.sitofp %253 : vector<8x64xi32> to vector<8x64xf32>
    %255 = arith.addf %247, %254 : vector<8x64xf32>
    %256 = vector.extract_strided_slice %230 {offsets = [0, 3], sizes = [8, 1], strides = [1, 1]} : vector<8x8xi32> to vector<8x1xi32>
    %257 = vector.shape_cast %256 : vector<8x1xi32> to vector<8xi32>
    %258 = vector.shape_cast %257 : vector<8xi32> to vector<8x1xi32>
    %259 = vector.broadcast %258 : vector<8x1xi32> to vector<8x64xi32>
    %260 = arith.cmpi eq, %259, %6 : vector<8x64xi32>
    %261 = arith.extui %260 : vector<8x64xi1> to vector<8x64xi32>
    %262 = arith.sitofp %261 : vector<8x64xi32> to vector<8x64xf32>
    %263 = arith.addf %255, %262 : vector<8x64xf32>
    %264 = vector.extract_strided_slice %230 {offsets = [0, 4], sizes = [8, 1], strides = [1, 1]} : vector<8x8xi32> to vector<8x1xi32>
    %265 = vector.shape_cast %264 : vector<8x1xi32> to vector<8xi32>
    %266 = vector.shape_cast %265 : vector<8xi32> to vector<8x1xi32>
    %267 = vector.broadcast %266 : vector<8x1xi32> to vector<8x64xi32>
    %268 = arith.cmpi eq, %267, %6 : vector<8x64xi32>
    %269 = arith.extui %268 : vector<8x64xi1> to vector<8x64xi32>
    %270 = arith.sitofp %269 : vector<8x64xi32> to vector<8x64xf32>
    %271 = arith.addf %263, %270 : vector<8x64xf32>
    %272 = vector.extract_strided_slice %230 {offsets = [0, 5], sizes = [8, 1], strides = [1, 1]} : vector<8x8xi32> to vector<8x1xi32>
    %273 = vector.shape_cast %272 : vector<8x1xi32> to vector<8xi32>
    %274 = vector.shape_cast %273 : vector<8xi32> to vector<8x1xi32>
    %275 = vector.broadcast %274 : vector<8x1xi32> to vector<8x64xi32>
    %276 = arith.cmpi eq, %275, %6 : vector<8x64xi32>
    %277 = arith.extui %276 : vector<8x64xi1> to vector<8x64xi32>
    %278 = arith.sitofp %277 : vector<8x64xi32> to vector<8x64xf32>
    %279 = arith.addf %271, %278 : vector<8x64xf32>
    %280 = vector.extract_strided_slice %230 {offsets = [0, 6], sizes = [8, 1], strides = [1, 1]} : vector<8x8xi32> to vector<8x1xi32>
    %281 = vector.shape_cast %280 : vector<8x1xi32> to vector<8xi32>
    %282 = vector.shape_cast %281 : vector<8xi32> to vector<8x1xi32>
    %283 = vector.broadcast %282 : vector<8x1xi32> to vector<8x64xi32>
    %284 = arith.cmpi eq, %283, %6 : vector<8x64xi32>
    %285 = arith.extui %284 : vector<8x64xi1> to vector<8x64xi32>
    %286 = arith.sitofp %285 : vector<8x64xi32> to vector<8x64xf32>
    %287 = arith.addf %279, %286 : vector<8x64xf32>
    %288 = vector.extract_strided_slice %230 {offsets = [0, 7], sizes = [8, 1], strides = [1, 1]} : vector<8x8xi32> to vector<8x1xi32>
    %289 = vector.shape_cast %288 : vector<8x1xi32> to vector<8xi32>
    %290 = vector.shape_cast %289 : vector<8xi32> to vector<8x1xi32>
    %291 = vector.broadcast %290 : vector<8x1xi32> to vector<8x64xi32>
    %292 = arith.cmpi eq, %291, %6 : vector<8x64xi32>
    %293 = arith.extui %292 : vector<8x64xi1> to vector<8x64xi32>
    %294 = arith.sitofp %293 : vector<8x64xi32> to vector<8x64xf32>
    %295 = arith.addf %287, %294 : vector<8x64xf32>
    %296 = arith.truncf %295 : vector<8x64xf32> to vector<8x64xbf16>
    %c3_34 = arith.constant 3 : index
    %c0_35 = arith.constant 0 : index
    %c0_36 = arith.constant 0 : index
    %297 = vector.load %arg4[%c3_34, %c0_35, %c0_36] : memref<4x64x32xbf16, #tpu.memory_space<vmem>>, vector<1x64x32xbf16>
    %298 = vector.shape_cast %297 : vector<1x64x32xbf16> to vector<64x32xbf16>
    %cst_37 = arith.constant dense<0.000000e+00> : vector<8x32xf32>
    %299 = tpu.matmul %296, %298, %cst_37 {dimension_numbers = #tpu.dot_dimension_numbers<[1], [0], [0], [1], [0, 0, 1, 1], [], []>} : vector<8x64xbf16>, vector<64x32xbf16>, vector<8x32xf32> -> vector<8x32xf32>
    %c0_38 = arith.constant 0 : index
    %c96 = arith.constant 96 : index
    %300 = vector.load %arg5[%c0_38, %c96] : memref<8x128xf32, #tpu.memory_space<vmem>>, vector<8x32xf32>
    %301 = arith.addf %300, %299 : vector<8x32xf32>
    %c0_39 = arith.constant 0 : index
    %c96_40 = arith.constant 96 : index
    %302 = vector.load %arg5[%c0_39, %c96_40] : memref<8x128xf32, #tpu.memory_space<vmem>>, vector<8x32xf32>
    tpu.vector_store %arg5[%c0_39, %c96_40], %301 {strides = array<i32>} : memref<8x128xf32, #tpu.memory_space<vmem>>, vector<8x32xf32>,
    return
  }
  func.func @transform_0(%arg0: i32, %arg1: i32, %arg2: i32) -> (i32, i32, i32) {
    %c0_i32 = arith.constant 0 : i32
    %c0_i32_0 = arith.constant 0 : i32
    return %arg1, %arg0, %c0_i32 : i32, i32, i32
  }
  func.func @transform_1(%arg0: i32, %arg1: i32, %arg2: i32) -> (i32, i32, i32) {
    %c0_i32 = arith.constant 0 : i32
    %c0_i32_0 = arith.constant 0 : i32
    return %arg1, %arg2, %c0_i32 : i32, i32, i32
  }
  func.func @transform_2(%arg0: i32, %arg1: i32, %arg2: i32) -> (i32, i32) {
    %c0_i32 = arith.constant 0 : i32
    return %arg0, %arg1 : i32, i32
  }
}

</mosaic_0001>

<bundles_post_ra>
// kernel: tpu_custom_call.1
= control target key start
LH: loop header
LB: loop body
LE: loop exit
PB: predicated region body
PF: predicated region fallthrough
CT: control target
= control target key end

     0   :  { %v709_v1 = vmov 2   ;;  %v710_v2 = vmov 0   ;;  %s877_s0 = inlined_call_operand.vmem [shape: s32[4,8,8], index: 0, kind: input, shape index: {}]   ;;  %s878_s1 = inlined_call_operand.vmem [shape: bf16[4,64,32], index: 1, kind: input, shape index: {}]   ;;  %s879_s2 = inlined_call_operand.hbm [shape: f32[8,128], index: 2, kind: output, shape index: {}]  }
   0x1   :  { %v523_v0 = vld [vmem:[%s877_s0 + $0x8] sm:$0xff]  ;;  %656 = vset.pattern.permute.xlu1 %v709_v1  ;;  %654 = vset.pattern.permute.xlu0 %v710_v2  ;;  %v557_v3 = vld [vmem:[%s877_s0 + $0x10] sm:$0xff] }
   0x2   :  { %7 = vsyncpa [#allocation3], 0  ;;  %151 = vperm.xlu1 %656, %v523_v0   ;;  %137 = vperm.xlu0 %654, %v523_v0   ;;  %v711_v4 = vmov 3   ;;  %v712_v5 = vmov 1   ;;  %v591_v6 = vld [vmem:[%s877_s0 + $0x18] sm:$0xff]  ;;  %v713_v7 = vmov 4   ;;  %v19_v21 = vlaneseq }
   0x3   :  { %658 = vset.pattern.permute.xlu2 %v710_v2  ;;  %v714_v8 = vmov 5   ;;  %v715_v9 = vmov 6   ;;  %v716_v10 = vmov 7   ;;  %v717_v11 = vmov 0.0   ;;  %v23_v12 = vld [vmem:[%s877_s0] sm:$0xff]  ;;  %v632_v14 = vld [vmem:[%s878_s1 + $0x38] sm:$0xff] }
   0x4   :  { %253 = vperm.xlu2 %658, %v557_v3   ;;  %17 = vst [vmem:[#allocation2] sm:$0xff] %v717_v11  ;;  %233 = vmatpush.bf16.msra.mxu1 %v632_v14  ;;  %v631_v15 = vld [vmem:[%s878_s1 + $0x30] sm:$0xff]  ;;  %v630_v16 = vld [vmem:[%s878_s1 + $0x28] sm:$0xff]  ;;  %v629_v18 = vld [vmem:[%s878_s1 + $0x20] sm:$0xff]  ;;  %v764_v23 = vand.u32 127, %v19_v21  ;;  %vm113_vm8 = vcmask 523264  }
   0x5   :  { %v636_v26 = vld [vmem:[%s878_s1 + $0x58] sm:$0xff]  ;;  %v635_v30 = vld [vmem:[%s878_s1 + $0x50] sm:$0xff]  ;;  %v634_v34 = vld [vmem:[%s878_s1 + $0x48] sm:$0xff]  ;;  %s719_s19 = smov 64   ;;  %s720_s20 = smov 96  }
   0x6   :  { %349 = vmatpush.bf16.msra.mxu2 %v636_v26  ;;  %v633_v39 = vld [vmem:[%s878_s1 + $0x40] sm:$0xff]  ;;  %v640_v50 = vld [vmem:[%s878_s1 + $0x78] sm:$0xff]  ;;  %v639_v54 = vld [vmem:[%s878_s1 + $0x70] sm:$0xff]  ;;  %s721_s21 = smov [#allocation2]   ;;  %s489_s25 = sshll.u32 %s879_s2, 4  ;;  %s490_s25 = int_to_ptr.hbm [resolvable:$true] %s489_s25 }
   0x7   :  { %465 = vmatpush.bf16.msra.mxu3 %v640_v50  ;;  %v638_v58 = vld [vmem:[%s878_s1 + $0x68] sm:$0xff]  ;;  %v637_v63 = vld [vmem:[%s878_s1 + $0x60] sm:$0xff]  ;;  %v628_v21 = vld [vmem:[%s878_s1 + $0x18] sm:$0xff]  ;;  %s487_s22 = sshll.u32 %s721_s21, 4  ;;  %s488_s22 = int_to_ptr.vmem [resolvable:$true] %s487_s22 }
   0x8   :  { %234 = vmatpush.bf16.msra.mxu1 %v631_v15  ;;  %121 = vmatpush.bf16.msra.mxu0 %v628_v21 }
   0xa   :  { %657 = vset.pattern.permute.xlu1 %v711_v4  ;;  %655 = vset.pattern.permute.xlu0 %v712_v5 }
   0xb   :  { %158 = vperm.xlu1 %657, %v523_v0   ;;  %144 = vperm.xlu0 %655, %v523_v0  }
   0xc   :  { %659 = vset.pattern.permute.xlu2 %v712_v5  ;;  %235 = vmatpush.bf16.msra.mxu1 %v630_v16 }
   0xd   :  { %260 = vperm.xlu2 %659, %v557_v3   ;;  %350 = vmatpush.bf16.msra.mxu2 %v635_v30 }
   0xe   :  { %466 = vmatpush.bf16.msra.mxu3 %v639_v54 }
  0x10   :  { %236 = vmatpush.bf16.msra.mxu1 %v629_v18 }
  0x11   :  { %351 = vmatpush.bf16.msra.mxu2 %v634_v34 }
  0x12   :  { %467 = vmatpush.bf16.msra.mxu3 %v638_v58 }
  0x13   :  { %660 = vset.pattern.permute.xlu1 %v713_v7  ;;  %376 = vperm.xlu0 %655, %v591_v6  }
  0x14   :  { %165 = vperm.xlu1 %660, %v523_v0  }
  0x15   :  { %661 = vset.pattern.permute.xlu2 %v709_v1  ;;  %352 = vmatpush.bf16.msra.mxu2 %v633_v39  ;;  %v625_v39 = vld [vmem:[%s878_s1] sm:$0xff] }
  0x16   :  { %267 = vperm.xlu2 %661, %v557_v3   ;;  %468 = vmatpush.bf16.msra.mxu3 %v637_v63 }
  0x1b   :  { %668 = vset.pattern.permute.xlu0 %v714_v8 }
  0x1c   :  { %662 = vset.pattern.permute.xlu1 %v711_v4  ;;  %172 = vperm.xlu0 %668, %v523_v0  }
  0x1d   :  { %274 = vperm.xlu1 %662, %v557_v3  }
  0x1e   :  { %663 = vset.pattern.permute.xlu2 %v715_v9 }
  0x1f   :  { %179 = vperm.xlu2 %663, %v523_v0  }
  0x24   :  { %288 = vperm.xlu0 %668, %v557_v3  }
  0x25   :  { %664 = vset.pattern.permute.xlu1 %v713_v7 }
  0x26   :  { %281 = vperm.xlu1 %664, %v557_v3  }
  0x27   :  { %665 = vset.pattern.permute.xlu2 %v716_v10 }
  0x28   :  { %186 = vperm.xlu2 %665, %v523_v0  }
  0x2c   :  { %404 = vperm.xlu0 %668, %v591_v6  }
  0x2e   :  { %666 = vset.pattern.permute.xlu1 %v715_v9 }
  0x2f   :  { %295 = vperm.xlu1 %666, %v557_v3  }
  0x30   :  { %667 = vset.pattern.permute.xlu2 %v710_v2 }
  0x31   :  { %369 = vperm.xlu2 %667, %v591_v6  }
  0x34   :  { %677 = vset.pattern.permute.xlu0 %v709_v1 }
  0x35   :  { %39 = vperm.xlu0 %677, %v23_v12  }
  0x37   :  { %669 = vset.pattern.permute.xlu1 %v716_v10 }
  0x38   :  { %302 = vperm.xlu1 %669, %v557_v3  }
  0x39   :  { %670 = vset.pattern.permute.xlu2 %v709_v1 }
  0x3a   :  { %383 = vperm.xlu2 %670, %v591_v6  }
  0x3d   :  { %682 = vset.pattern.permute.xlu0 %v716_v10 }
  0x3e   :  { %74 = vperm.xlu0 %682, %v23_v12  }
  0x40   :  { %671 = vset.pattern.permute.xlu1 %v711_v4 }
  0x41   :  { %390 = vperm.xlu1 %671, %v591_v6  }
  0x42   :  { %672 = vset.pattern.permute.xlu2 %v713_v7 }
  0x43   :  { %397 = vperm.xlu2 %672, %v591_v6  }
  0x49   :  { %673 = vset.pattern.permute.xlu1 %v715_v9 }
  0x4a   :  { %411 = vperm.xlu1 %673, %v591_v6  }
  0x4b   :  { %674 = vset.pattern.permute.xlu2 %v716_v10 }
  0x4c   :  { %418 = vperm.xlu2 %674, %v591_v6  }
  0x52   :  { %675 = vset.pattern.permute.xlu1 %v710_v2 }
  0x53   :  { %25 = vperm.xlu1 %675, %v23_v12  }
  0x54   :  { %676 = vset.pattern.permute.xlu2 %v712_v5 }
  0x55   :  { %32 = vperm.xlu2 %676, %v23_v12  }
  0x5b   :  { %678 = vset.pattern.permute.xlu1 %v711_v4 }
  0x5c   :  { %46 = vperm.xlu1 %678, %v23_v12  }
  0x5d   :  { %679 = vset.pattern.permute.xlu2 %v713_v7 }
  0x5e   :  { %53 = vperm.xlu2 %679, %v23_v12   ;;  %v750_v13 = vpop.permute.xlu2 %253 }
  0x5f   :  { %vm255_vm9 = vcmp.eq.s32.totalorder %v750_v13, %v764_v23 }
  0x60   :  { %v558_v55 = vsel %vm255_vm9, 1.0, %v717_v11 }
  0x64   :  { %680 = vset.pattern.permute.xlu1 %v714_v8 }
  0x65   :  { %60 = vperm.xlu1 %680, %v23_v12  }
  0x66   :  { %681 = vset.pattern.permute.xlu2 %v715_v9 }
  0x67   :  { %67 = vperm.xlu2 %681, %v23_v12   ;;  %v261_v17 = vpop.permute.xlu2 %260 }
  0x68   :  { %vm262_vm10 = vcmp.eq.s32.totalorder %v261_v17, %v764_v23 }
  0x69   :  { %v559_v56 = vsel %vm262_vm10, 1.0, %v717_v11 }
  0x6a   :  { %v265_v59 = vadd.f32 %v559_v56, %v558_v55 }
  0x70   :  { %v268_v22 = vpop.permute.xlu2 %267 }
  0x71   :  { %vm269_vm11 = vcmp.eq.s32.totalorder %v268_v22, %v764_v23 }
  0x72   :  { %v560_v60 = vsel %vm269_vm11, 1.0, %v717_v11 }
  0x73   :  { %v272_v0 = vadd.f32 %v560_v60, %v265_v59 }
  0x74   :  { %v152_v19 = vpop.permute.xlu1 %151  ;;  %v138_v20 = vpop.permute.xlu0 %137 }
  0x75   :  { %vm139_vm0 = vcmp.eq.s32.totalorder %v138_v20, %v764_v23  ;;  %vm153_vm2 = vcmp.eq.s32.totalorder %v152_v19, %v764_v23 }
  0x76   :  { %v524_v27 = vsel %vm139_vm0, 1.0, %v717_v11  ;;  %v526_v35 = vsel %vm153_vm2, 1.0, %v717_v11 }
  0x79   :  { %v180_v29 = vpop.permute.xlu2 %179 }
  0x7a   :  { %vm181_vm5 = vcmp.eq.s32.totalorder %v180_v29, %v764_v23 }
  0x7b   :  { %v530_v45 = vsel %vm181_vm5, 1.0, %v717_v11 }
  0x7d   :  { %v159_v24 = vpop.permute.xlu1 %158  ;;  %v145_v25 = vpop.permute.xlu0 %144 }
  0x7e   :  { %vm146_vm1 = vcmp.eq.s32.totalorder %v145_v25, %v764_v23  ;;  %vm160_vm3 = vcmp.eq.s32.totalorder %v159_v24, %v764_v23  ;;  %v627_v25 = vld [vmem:[%s878_s1 + $0x10] sm:$0xff] }
  0x7f   :  { %v525_v28 = vsel %vm146_vm1, 1.0, %v717_v11  ;;  %v527_v37 = vsel %vm160_vm3, 1.0, %v717_v11  ;;  %122 = vmatpush.bf16.msra.mxu0 %v627_v25 }
  0x80   :  { %v149_v31 = vadd.f32 %v525_v28, %v524_v27 }
  0x82   :  { %v156_v36 = vadd.f32 %v526_v35, %v149_v31  ;;  %v187_v41 = vpop.permute.xlu2 %186 }
  0x83   :  { %vm188_vm6 = vcmp.eq.s32.totalorder %v187_v41, %v764_v23 }
  0x84   :  { %v163_v40 = vadd.f32 %v527_v37, %v156_v36  ;;  %v531_v48 = vsel %vm188_vm6, 1.0, %v717_v11 }
  0x85   :  { %v777_v32 = vpop.permute.xlu0 %376 }
  0x86   :  { %v166_v33 = vpop.permute.xlu1 %165  ;;  %vm378_vm0 = vcmp.eq.s32.totalorder %v777_v32, %v764_v23 }
  0x87   :  { %vm167_vm4 = vcmp.eq.s32.totalorder %v166_v33, %v764_v23  ;;  %v593_v13 = vsel %vm378_vm0, 1.0, %v717_v11  ;;  %v626_v33 = vld [vmem:[%s878_s1 + $0x8] sm:$0xff]  ;;  %s718_s1 = smov 32  }
  0x88   :  { %v528_v38 = vsel %vm167_vm4, 1.0, %v717_v11  ;;  %123 = vmatpush.bf16.msra.mxu0 %v626_v33 }
  0x89   :  { %v170_v43 = vadd.f32 %v528_v38, %v163_v40 }
  0x8b   :  { %v370_v57 = vpop.permute.xlu2 %369 }
  0x8c   :  { %vm371_vm1 = vcmp.eq.s32.totalorder %v370_v57, %v764_v23  ;;  %124 = vmatpush.bf16.msra.mxu0 %v625_v39 }
  0x8d   :  { %v592_v14 = vsel %vm371_vm1, 1.0, %v717_v11 }
  0x8e   :  { %v173_v42 = vpop.permute.xlu0 %172  ;;  %v381_v18 = vadd.f32 %v593_v13, %v592_v14 }
  0x8f   :  { %vm174_vm7 = vcmp.eq.s32.totalorder %v173_v42, %v764_v23  ;;  %v275_v44 = vpop.permute.xlu1 %274 }
  0x90   :  { %v529_v46 = vsel %vm174_vm7, 1.0, %v717_v11  ;;  %vm276_vm12 = vcmp.eq.s32.totalorder %v275_v44, %v764_v23 }
  0x91   :  { %v177_v47 = vadd.f32 %v529_v46, %v170_v43  ;;  %v561_v61 = vsel %vm276_vm12, 1.0, %v717_v11 }
  0x92   :  { %v279_v3 = vadd.f32 %v561_v61, %v272_v0 }
  0x93   :  { %v184_v49 = vadd.f32 %v530_v45, %v177_v47 }
  0x94   :  { %v384_v5 = vpop.permute.xlu2 %383 }
  0x95   :  { %v191_v51 = vadd.f32 %v531_v48, %v184_v49  ;;  %vm385_vm3 = vcmp.eq.s32.totalorder %v384_v5, %v764_v23 }
  0x96   :  { %v289_v62 = vpop.permute.xlu0 %288  ;;  %v594_v19 = vsel %vm385_vm3, 1.0, %v717_v11  ;;  %vm248_vm3 = vcmask 523520  }
  0x97   :  { %v192_v52 = vpack.c.bf16 %v191_v51, %v191_v51  ;;  %vm290_vm14 = vcmp.eq.s32.totalorder %v289_v62, %v764_v23  ;;  %v388_v22 = vadd.f32 %v594_v19, %v381_v18 }
  0x98   :  { %v282_v53 = vpop.permute.xlu1 %281  ;;  %v563_v6 = vsel %vm290_vm14, 1.0, %v717_v11 }
  0x99   :  { %556 = vmatmul.msk.bf16.vlgmr.msra.gmra.mxu1 %vm113_vm8, %v192_v52  ;;  %vm283_vm13 = vcmp.eq.s32.totalorder %v282_v53, %v764_v23 }
  0x9a   :  { %v562_v2 = vsel %vm283_vm13, 1.0, %v717_v11 }
  0x9b   :  { %v286_v4 = vadd.f32 %v562_v2, %v279_v3 }
  0x9d   :  { %v293_v8 = vadd.f32 %v563_v6, %v286_v4  ;;  %v398_v16 = vpop.permute.xlu2 %397 }
  0x9e   :  { %vm399_vm4 = vcmp.eq.s32.totalorder %v398_v16, %v764_v23  ;;  %v405_v26 = vpop.permute.xlu0 %404 }
  0x9f   :  { %v596_v28 = vsel %vm399_vm4, 1.0, %v717_v11  ;;  %vm406_vm6 = vcmp.eq.s32.totalorder %v405_v26, %v764_v23  ;;  %vm480_vm4 = vcmask 1048320  }
  0xa0   :  { %v597_v31 = vsel %vm406_vm6, 1.0, %v717_v11 }
  0xa1   :  { %v296_v1 = vpop.permute.xlu1 %295 }
  0xa2   :  { %vm297_vm15 = vcmp.eq.s32.totalorder %v296_v1, %v764_v23 }
  0xa3   :  { %v564_v7 = vsel %vm297_vm15, 1.0, %v717_v11 }
  0xa4   :  { %v300_v10 = vadd.f32 %v564_v7, %v293_v8 }
  0xa6   :  { %v419_v29 = vpop.permute.xlu2 %418 }
  0xa7   :  { %vm420_vm7 = vcmp.eq.s32.totalorder %v419_v29, %v764_v23  ;;  %v40_v43 = vpop.permute.xlu0 %39 }
  0xa8   :  { %v599_v36 = vsel %vm420_vm7, 1.0, %v717_v11  ;;  %vm41_vm12 = vcmp.eq.s32.totalorder %v40_v43, %v764_v23 }
  0xa9   :  { %v500_v48 = vsel %vm41_vm12, 1.0, %v717_v11 }
  0xaa   :  { %v303_v9 = vpop.permute.xlu1 %302 }
  0xab   :  { %vm304_vm2 = vcmp.eq.s32.totalorder %v303_v9, %v764_v23 }
  0xac   :  { %v565_v12 = vsel %vm304_vm2, 1.0, %v717_v11  ;;  %vm132_vm2 = vcmask 261120  }
  0xad   :  { %v307_v15 = vadd.f32 %v565_v12, %v300_v10 }
  0xaf   :  { %v308_v17 = vpack.c.bf16 %v307_v15, %v307_v15  ;;  %v33_v38 = vpop.permute.xlu2 %32 }
  0xb0   :  { %vm34_vm10 = vcmp.eq.s32.totalorder %v33_v38, %v764_v23  ;;  %v75_v55 = vpop.permute.xlu0 %74 }
  0xb1   :  { %590 = vmatmul.msk.bf16.vlgmr.msra.gmra.mxu2 %vm113_vm8, %v308_v17  ;;  %v499_v45 = vsel %vm34_vm10, 1.0, %v717_v11  ;;  %vm76_vm1 = vcmp.eq.s32.totalorder %v75_v55, %v764_v23 }
  0xb2   :  { %v505_v61 = vsel %vm76_vm1, 1.0, %v717_v11 }
  0xb3   :  { %v391_v20 = vpop.permute.xlu1 %390 }
  0xb4   :  { %vm392_vm5 = vcmp.eq.s32.totalorder %v391_v20, %v764_v23 }
  0xb5   :  { %v595_v24 = vsel %vm392_vm5, 1.0, %v717_v11 }
  0xb6   :  { %v395_v27 = vadd.f32 %v595_v24, %v388_v22 }
  0xb8   :  { %v402_v30 = vadd.f32 %v596_v28, %v395_v27  ;;  %v54_v46 = vpop.permute.xlu2 %53 }
  0xb9   :  { %vm55_vm14 = vcmp.eq.s32.totalorder %v54_v46, %v764_v23 }
  0xba   :  { %v409_v34 = vadd.f32 %v597_v31, %v402_v30  ;;  %v502_v53 = vsel %vm55_vm14, 1.0, %v717_v11 }
  0xbc   :  { %v412_v32 = vpop.permute.xlu1 %411 }
  0xbd   :  { %vm413_vm9 = vcmp.eq.s32.totalorder %v412_v32, %v764_v23 }
  0xbe   :  { %v598_v35 = vsel %vm413_vm9, 1.0, %v717_v11 }
  0xbf   :  { %v416_v37 = vadd.f32 %v598_v35, %v409_v34 }
  0xc1   :  { %v423_v40 = vadd.f32 %v599_v36, %v416_v37  ;;  %v68_v54 = vpop.permute.xlu2 %67 }
  0xc2   :  { %vm69_vm15 = vcmp.eq.s32.totalorder %v68_v54, %v764_v23 }
  0xc3   :  { %v424_v41 = vpack.c.bf16 %v423_v40, %v423_v40  ;;  %v504_v59 = vsel %vm69_vm15, 1.0, %v717_v11 }
  0xc5   :  { %624 = vmatmul.msk.bf16.vlgmr.msra.gmra.mxu3 %vm113_vm8, %v424_v41  ;;  %v26_v42 = vpop.permute.xlu1 %25 }
  0xc6   :  { %vm27_vm11 = vcmp.eq.s32.totalorder %v26_v42, %v764_v23 }
  0xc7   :  { %v498_v44 = vsel %vm27_vm11, 1.0, %v717_v11 }
  0xc8   :  { %v37_v47 = vadd.f32 %v499_v45, %v498_v44 }
  0xca   :  { %v44_v50 = vadd.f32 %v500_v48, %v37_v47 }
  0xce   :  { %v47_v49 = vpop.permute.xlu1 %46 }
  0xcf   :  { %vm48_vm13 = vcmp.eq.s32.totalorder %v47_v49, %v764_v23 }
  0xd0   :  { %v501_v51 = vsel %vm48_vm13, 1.0, %v717_v11 }
  0xd1   :  { %v51_v52 = vadd.f32 %v501_v51, %v44_v50 }
  0xd3   :  { %v58_v56 = vadd.f32 %v502_v53, %v51_v52 }
  0xd7   :  { %v61_v57 = vpop.permute.xlu1 %60 }
  0xd8   :  { %vm62_vm0 = vcmp.eq.s32.totalorder %v61_v57, %v764_v23 }
  0xd9   :  { %v503_v58 = vsel %vm62_vm0, 1.0, %v717_v11 }
  0xda   :  { %v65_v60 = vadd.f32 %v503_v58, %v58_v56 }
  0xdc   :  { %v72_v62 = vadd.f32 %v504_v59, %v65_v60 }
  0xde   :  { %v79_v63 = vadd.f32 %v505_v61, %v72_v62 }
  0xe0   :  { %v80_v0 = vpack.c.bf16 %v79_v63, %v79_v63 }
  0xe2   :  { %522 = vmatmul.msk.bf16.vlgmr.msra.gmra.mxu0 %vm113_vm8, %v80_v0  ;;  %vm364_vm8 = vcmask 785920  }
 0x116   :  { %v238_v1 = vpop.f32.mrf.mxu1 }
 0x117   :  { %244 = vrot.lane.b32.xlu1 %v238_v1, %s718_s1 }
 0x11e   :  { %v240_v2 = vpop.f32.mrf.mxu1 }
 0x134   :  { %v354_v3 = vpop.f32.mrf.mxu2 }
 0x135   :  { %360 = vrot.lane.b32.xlu2 %v354_v3, %s719_s19 }
 0x13c   :  { %v356_v23 = vpop.f32.mrf.mxu2 }
 0x148   :  { %v470_v4 = vpop.f32.mrf.mxu3 }
 0x149   :  { %476 = vrot.lane.b32.xlu1 %v470_v4, %s720_s20 }
 0x150   :  { %v472_v5 = vpop.f32.mrf.mxu3 }
 0x15f   :  { %v126_v6 = vpop.f32.mrf.mxu0 }
 0x160   :  { %133 = vst.msk [vmem:[#allocation2] sm:$0xff] %vm132_vm2, %v126_v6 }
 0x167   :  { %v128_v11 = vpop.f32.mrf.mxu0  ;;  %v242_v7 = vld [vmem:[#allocation2] sm:$0xff] }
 0x189   :  { %v245_v8 = vpop.permute.xlu1 %244 }
 0x18a   :  { %v247_v9 = vadd.f32 %v245_v8, %v242_v7 }
 0x18c   :  { %249 = vst.msk [vmem:[#allocation2] sm:$0xff] %vm248_vm3, %v247_v9 }
 0x18f   :  { %v361_v10 = vpop.permute.xlu2 %360 }
 0x193   :  { %v358_v12 = vld [vmem:[#allocation2] sm:$0xff] }
 0x194   :  { %v363_v13 = vadd.f32 %v361_v10, %v358_v12 }
 0x196   :  { %365 = vst.msk [vmem:[#allocation2] sm:$0xff] %vm364_vm8, %v363_v13 }
 0x19d   :  { %v474_v15 = vld [vmem:[#allocation2] sm:$0xff] }
 0x1bb   :  { %v477_v14 = vpop.permute.xlu1 %476 }
 0x1bc   :  { %v479_v16 = vadd.f32 %v477_v14, %v474_v15 }
 0x1be   :  { %481 = vst.msk [vmem:[#allocation2] sm:$0xff] %vm480_vm4, %v479_v16 }
 0x1bf   :  { %492 = dma.vmem_to_hbm [thread:$0]  %s488_s22, 128, %s490_s25, [#allocation3]  }
 0x1c0   :  { %707 = dma.done.wait [#allocation3], 128  }
 0x1c1   :  { %708 = vsyncadd [#allocation3], 4294967168 }
 0x1c2   :  { %497 = vsyncpa [#allocation3], 1 }

</bundles_post_ra>
